<compile_context>
chip_gen: v6e
topology: v6e:2x2x1
jax: 0.10.0
libtpu: 0.0.40
codegen_flags: <defaults>
</compile_context>

<pallas_src>
import functools
import math

import jax
import jax.numpy as jnp
from jax.experimental import pallas as pl
from jax.experimental.pallas import tpu as pltpu

EPS = 1e-5

_ROW_FLOOR = 512   # min rows per grid step when splitting (keeps DMA granularity)
_ROW_CAP = 8192    # max rows per grid step
_MIN_STEPS = 8     # target grid steps: >=4 per TC on v7x megacore, >=8 on 1-TC chips


@functools.lru_cache(maxsize=None)
def _vmem_budgets():
    """(row-block VMEM budget, vmem_limit_bytes cap) per TPU generation."""
    phys = None
    try:
        info = pltpu.get_tpu_info()
        for name in ("vmem_capacity_bytes", "vmem_size_bytes", "vmem_bytes"):
            v = getattr(info, name, None)
            if v:
                phys = int(v)
                break
    except Exception:
        phys = None
    if phys is not None and phys >= (100 << 20):
        # v5e / v6e: 128 MiB physical VMEM -> bigger blocks, higher limit.
        return 64 << 20, 96 << 20
    # v7x (64 MiB physical per TC) or unknown: conservative, leave headroom.
    return 24 << 20, 52 << 20


def _choose_block_rows(prows, dp, itemsize, budget):
    """Rows per grid step: fit VMEM budget, aim for >= _MIN_STEPS steps."""
    bytes_per_row = 4 * dp * itemsize          # in + out, each double-buffered
    cap = budget // bytes_per_row
    cap = max(16, min(_ROW_CAP, (cap // 16) * 16))
    per_step = max(_ROW_FLOOR, pl.cdiv(prows, _MIN_STEPS))
    per_step = ((per_step + 15) // 16) * 16
    br = min(cap, per_step)
    if prows <= br:
        return prows                            # single block == full array dim
    return br


def _make_rowsum_kernel(inv_d, has_bias):
    """Per-row stats via cross-lane reductions (D already lane-wide, or tiny tail)."""

    def kernel(x_ref, w_ref, *rest):
        b_ref, o_ref = rest if has_bias else (None, rest[0])
        x = x_ref[...].astype(jnp.float32)
        mean = jnp.sum(x, axis=-1, keepdims=True) * inv_d
        xc = x - mean
        var = jnp.sum(xc * xc, axis=-1, keepdims=True) * inv_d
        y = xc * jax.lax.rsqrt(var + EPS) * w_ref[...]
        if b_ref is not None:
            y = y + b_ref[...]
        o_ref[...] = y.astype(o_ref.dtype)

    return kernel


def _make_packed_kernel(inv_d, has_bias, exact_bf16_input):
    """k logical rows packed along the 128-lane axis; per-chunk stats via the MXU.

    x_ref block is (block_rows, k*D). bd_ref is the (k*D, k*D) block-diagonal ones
    matrix, so v @ bd broadcasts each D-chunk's sum back over its own chunk. The
    bf16 hi/lo split keeps sums at ~f32 accuracy on the bf16 MXU; when the input
    is already bf16 the mean sum needs no split (values exactly representable).
    """

    def kernel(x_ref, bd_ref, w_ref, *rest):
        b_ref, o_ref = rest if has_bias else (None, rest[0])
        x = x_ref[...].astype(jnp.float32)
        bd = bd_ref[...]  # bf16; 0/1 entries are exact

        def chunk_sums(v, exact=False):
            if exact:
                return jnp.dot(v.astype(jnp.bfloat16), bd,
                               preferred_element_type=jnp.float32)
            v_hi = v.astype(jnp.bfloat16)
            v_lo = (v - v_hi.astype(jnp.float32)).astype(jnp.bfloat16)
            return (jnp.dot(v_hi, bd, preferred_element_type=jnp.float32)
                    + jnp.dot(v_lo, bd, preferred_element_type=jnp.float32))

        mean = chunk_sums(x, exact=exact_bf16_input) * inv_d
        xc = x - mean
        var = chunk_sums(xc * xc) * inv_d
        y = xc * jax.lax.rsqrt(var + EPS) * w_ref[...]
        if b_ref is not None:
            y = y + b_ref[...]
        o_ref[...] = y.astype(o_ref.dtype)

    return kernel


def _pallas_ln_2d(x2, w_row, b_row, *, d, block_rows=None):
    """LayerNorm over each D-chunk of a (prows, dp) array; dp = k*d (k >= 1)."""
    prows, dp = x2.shape
    packed = dp != d
    has_bias = b_row is not None
    itemsize = x2.dtype.itemsize
    budget, limit_cap = _vmem_budgets()

    if block_rows is None:
        br = _choose_block_rows(prows, dp, itemsize, budget)
    else:
        mult = 16 if itemsize < 4 else 8        # bf16 packs 16 rows per sublane tile
        br = max(mult, (int(block_rows) // mult) * mult)
        cap = max(mult, (budget // (4 * dp * itemsize) // mult) * mult)
        br = min(br, cap)                       # clamp to VMEM budget
        if prows < br:
            br = prows

    grid = (pl.cdiv(prows, br),)
    row_spec = pl.BlockSpec((br, dp), lambda i: (i, 0))
    vec_spec = pl.BlockSpec((1, dp), lambda i: (0, 0))
    inv_d = 1.0 / float(d)

    inputs, in_specs = [x2], [row_spec]
    if packed:
        seg = jnp.arange(dp, dtype=jnp.int32) // d
        bd = (seg[:, None] == seg[None, :]).astype(jnp.bfloat16)
        inputs.append(bd)
        in_specs.append(pl.BlockSpec((dp, dp), lambda i: (0, 0)))
        kernel = _make_packed_kernel(inv_d, has_bias,
                                     exact_bf16_input=(x2.dtype == jnp.bfloat16))
    else:
        kernel = _make_rowsum_kernel(inv_d, has_bias)
    inputs.append(w_row)
    in_specs.append(vec_spec)
    if has_bias:
        inputs.append(b_row)
        in_specs.append(vec_spec)

    # Double-buffered in + out row blocks, resident bd / affine rows, plus slack;
    # capped below physical VMEM (52 MiB on v7x, 96 MiB on v5e/v6e).
    block_bytes = 4 * br * dp * itemsize
    extra_bytes = (2 * dp * dp * 2 if packed else 0) + 4 * dp * 4
    vmem_limit = int(min(limit_cap,
                         max(32 << 20, block_bytes + extra_bytes + (8 << 20))))

    return pl.pallas_call(
        kernel,
        out_shape=jax.ShapeDtypeStruct((prows, dp), x2.dtype),
        grid_spec=pltpu.PrefetchScalarGridSpec(
            num_scalar_prefetch=0,
            grid=grid,
            in_specs=in_specs,
            out_specs=row_spec,
        ),
        compiler_params=pltpu.CompilerParams(
            dimension_semantics=("parallel",),
            vmem_limit_bytes=vmem_limit,
        ),
    )(*inputs)


@functools.partial(jax.jit, static_argnames=("block_rows",))
def layer_norm(x, weight, bias=None, *, block_rows=None):
    """LayerNorm over the last dim of `x`; matches F.layer_norm(..., eps=1e-5)."""
    orig_shape = x.shape
    d = orig_shape[-1]
    rows = math.prod(orig_shape[:-1])
    has_bias = bias is not None

    x2 = x.reshape(rows, d)
    w1 = weight.astype(jnp.float32).reshape(1, d)
    b1 = bias.astype(jnp.float32).reshape(1, d) if has_bias else None

    # Lane packing: smallest k with (k*d) % 128 == 0 (dp stays at the smallest
    # multiple of 128); cap dp at 512 so the (dp, dp) bf16 bd matrix stays small.
    k = 1
    if d % 128 != 0:
        k_needed = 128 // math.gcd(d, 128)
        if k_needed * d <= 512 and rows >= k_needed:
            k = k_needed

    if k > 1:
        bulk = (rows // k) * k
        rem = rows - bulk
        xp = x2[:bulk].reshape(bulk // k, k * d)
        wk = jnp.tile(w1, (1, k))
        bk = jnp.tile(b1, (1, k)) if has_bias else None
        out_main = _pallas_ln_2d(xp, wk, bk, d=d,
                                 block_rows=block_rows).reshape(bulk, d)
        if rem:
            # Tiny (< k rows) tail handled lane-sparse; bulk keeps dense stores.
            out_rem = _pallas_ln_2d(x2[bulk:], w1, b1, d=d)
            out2 = jnp.concatenate([out_main, out_rem], axis=0)
        else:
            out2 = out_main
    else:
        out2 = _pallas_ln_2d(x2, w1, b1, d=d, block_rows=block_rows)

    return out2.reshape(orig_shape)


if __name__ == "__main__":
    def reference(x, w, b):
        xf = x.astype(jnp.float32)
        mean = jnp.mean(xf, axis=-1, keepdims=True)
        var = jnp.mean((xf - mean) ** 2, axis=-1, keepdims=True)
        y = (xf - mean) * jax.lax.rsqrt(var + EPS) * w.astype(jnp.float32)
        if b is not None:
            y = y + b.astype(jnp.float32)
        return y.astype(x.dtype)

    keys = jax.random.split(jax.random.PRNGKey(0), 8)

    # 1) Module config from the spec: ndim = hidden = 32, bias=True (ones/zeros).
    B, T, D = 2, 8, 32
    x = jax.random.normal(keys[0], (B, T, D), dtype=jnp.float32)
    w = jnp.ones((D,), jnp.float32)
    b = jnp.zeros((D,), jnp.float32)
    y = layer_norm(x, w, b)
    jax.block_until_ready(y)
    assert jnp.max(jnp.abs(y - reference(x, w, b))) < 1e-4, "packed path mismatch"

    # 2) Non-trivial affine params (validates weight/bias tiling wiring).
    w_r = 1.0 + 0.1 * jax.random.normal(keys[1], (D,), jnp.float32)
    b_r = 0.1 * jax.random.normal(keys[2], (D,), jnp.float32)
    y2 = layer_norm(x, w_r, b_r)
    jax.block_until_ready(y2)
    assert jnp.max(jnp.abs(y2 - reference(x, w_r, b_r))) < 1e-4, "affine wiring mismatch"

    # 3) Multi-step grid with a ragged last tile on the packed path.
    x3 = jax.random.normal(keys[3], (4, 250, D), dtype=jnp.float32)  # prows=250
    y3 = layer_norm(x3, w_r, b_r, block_rows=64)                     # 4 steps, ragged
    jax.block_until_ready(y3)
    assert jnp.max(jnp.abs(y3 - reference(x3, w_r, b_r))) < 1e-4, "ragged/multi-step mismatch"

    # 4) rows not divisible by k: packed bulk + rowsum remainder.
    x4 = jax.random.normal(keys[4], (2, 7, D), dtype=jnp.float32)    # rows=14, k=4
    y4 = layer_norm(x4, w_r, b_r)
    jax.block_until_ready(y4)
    assert jnp.max(jnp.abs(y4 - reference(x4, w_r, b_r))) < 1e-4, "remainder path mismatch"

    # 5) Generalized packing (D=192 -> k=2, dp=384), bias=None module variant.
    D5 = 192
    x5 = jax.random.normal(keys[5], (2, 8, D5), dtype=jnp.float32)
    w5 = 1.0 + 0.1 * jax.random.normal(keys[6], (D5,), jnp.float32)
    y5 = layer_norm(x5, w5, None)
    jax.block_until_ready(y5)
    assert jnp.max(jnp.abs(y5 - reference(x5, w5, None))) < 1e-4, "D=192 packing mismatch"

    # 6) Lane-wide D (rowsum path), bias=None.
    D6 = 128
    x6 = jax.random.normal(keys[7], (2, 8, D6), dtype=jnp.float32)
    w6 = w5[:D6]
    y6 = layer_norm(x6, w6, None)
    jax.block_until_ready(y6)
    assert jnp.max(jnp.abs(y6 - reference(x6, w6, None))) < 1e-4, "rowsum path mismatch"

    # 7) bf16 I/O (exercises the exact-bf16 mean path and 16-row alignment).
    x7 = x.astype(jnp.bfloat16)
    y7 = layer_norm(x7, w_r, b_r)
    jax.block_until_ready(y7)
    err = jnp.max(jnp.abs(y7.astype(jnp.float32)
                          - reference(x7, w_r, b_r).astype(jnp.float32)))
    assert err < 0.1, "bf16 path mismatch"

    print("KERNEL_OK")
</pallas_src>

<mosaic_0001>
module attributes {stable_mosaic.version = 11 : i64} {
  func.func @kernel(%arg0: i32, %arg1: memref<4x128xf32, #tpu.memory_space<vmem>>, %arg2: memref<128x128xbf16, #tpu.memory_space<vmem>>, %arg3: memref<1x128xf32, #tpu.memory_space<vmem>>, %arg4: memref<1x128xf32, #tpu.memory_space<vmem>>, %arg5: memref<4x128xf32, #tpu.memory_space<vmem>>) attributes {dimension_semantics = [#tpu.dimension_semantics<parallel>], iteration_bounds = array<i64: 1>, scalar_prefetch = 0 : i64, scratch_operands = 0 : i64, tpu.core_type = #tpu.core_type<tc>, window_params = [{transform_indices = @transform_0, window_bounds = array<i64: 4, 128>}, {pipeline_mode = #tpu.pipeline_mode<synchronous>, transform_indices = @transform_1, window_bounds = array<i64: 128, 128>}, {pipeline_mode = #tpu.pipeline_mode<synchronous>, transform_indices = @transform_2, window_bounds = array<i64: 1, 128>}, {pipeline_mode = #tpu.pipeline_mode<synchronous>, transform_indices = @transform_3, window_bounds = array<i64: 1, 128>}, {transform_indices = @transform_4, window_bounds = array<i64: 4, 128>}]} {
    %c0 = arith.constant 0 : index
    %c0_0 = arith.constant 0 : index
    %0 = vector.load %arg1[%c0, %c0_0] : memref<4x128xf32, #tpu.memory_space<vmem>>, vector<4x128xf32>
    %c0_1 = arith.constant 0 : index
    %c0_2 = arith.constant 0 : index
    %1 = vector.load %arg2[%c0_1, %c0_2] : memref<128x128xbf16, #tpu.memory_space<vmem>>, vector<128x128xbf16>
    %2 = arith.truncf %0 : vector<4x128xf32> to vector<4x128xbf16>
    %3 = arith.extf %2 : vector<4x128xbf16> to vector<4x128xf32>
    %4 = arith.subf %0, %3 : vector<4x128xf32>
    %5 = arith.truncf %4 : vector<4x128xf32> to vector<4x128xbf16>
    %cst = arith.constant dense<0.000000e+00> : vector<4x128xf32>
    %6 = tpu.matmul %2, %1, %cst {dimension_numbers = #tpu.dot_dimension_numbers<[1], [0], [0], [1], [0, 0, 1, 1], [], []>} : vector<4x128xbf16>, vector<128x128xbf16>, vector<4x128xf32> -> vector<4x128xf32>
    %cst_3 = arith.constant dense<0.000000e+00> : vector<4x128xf32>
    %7 = tpu.matmul %5, %1, %cst_3 {dimension_numbers = #tpu.dot_dimension_numbers<[1], [0], [0], [1], [0, 0, 1, 1], [], []>} : vector<4x128xbf16>, vector<128x128xbf16>, vector<4x128xf32> -> vector<4x128xf32>
    %8 = arith.addf %6, %7 : vector<4x128xf32>
    %cst_4 = arith.constant 3.125000e-02 : f32
    %9 = vector.broadcast %cst_4 : f32 to vector<4x128xf32>
    %10 = arith.mulf %8, %9 : vector<4x128xf32>
    %11 = arith.subf %0, %10 : vector<4x128xf32>
    %12 = arith.mulf %11, %11 : vector<4x128xf32>
    %13 = arith.truncf %12 : vector<4x128xf32> to vector<4x128xbf16>
    %14 = arith.extf %13 : vector<4x128xbf16> to vector<4x128xf32>
    %15 = arith.subf %12, %14 : vector<4x128xf32>
    %16 = arith.truncf %15 : vector<4x128xf32> to vector<4x128xbf16>
    %cst_5 = arith.constant dense<0.000000e+00> : vector<4x128xf32>
    %17 = tpu.matmul %13, %1, %cst_5 {dimension_numbers = #tpu.dot_dimension_numbers<[1], [0], [0], [1], [0, 0, 1, 1], [], []>} : vector<4x128xbf16>, vector<128x128xbf16>, vector<4x128xf32> -> vector<4x128xf32>
    %cst_6 = arith.constant dense<0.000000e+00> : vector<4x128xf32>
    %18 = tpu.matmul %16, %1, %cst_6 {dimension_numbers = #tpu.dot_dimension_numbers<[1], [0], [0], [1], [0, 0, 1, 1], [], []>} : vector<4x128xbf16>, vector<128x128xbf16>, vector<4x128xf32> -> vector<4x128xf32>
    %19 = arith.addf %17, %18 : vector<4x128xf32>
    %cst_7 = arith.constant 3.125000e-02 : f32
    %20 = vector.broadcast %cst_7 : f32 to vector<4x128xf32>
    %21 = arith.mulf %19, %20 : vector<4x128xf32>
    %cst_8 = arith.constant 9.99999974E-6 : f32
    %22 = vector.broadcast %cst_8 : f32 to vector<4x128xf32>
    %23 = arith.addf %21, %22 : vector<4x128xf32>
    %24 = math.rsqrt %23 : vector<4x128xf32>
    %25 = arith.mulf %11, %24 : vector<4x128xf32>
    %c0_9 = arith.constant 0 : index
    %c0_10 = arith.constant 0 : index
    %26 = vector.load %arg3[%c0_9, %c0_10] : memref<1x128xf32, #tpu.memory_space<vmem>>, vector<1x128xf32>
    %27 = vector.broadcast %26 : vector<1x128xf32> to vector<4x128xf32>
    %28 = arith.mulf %25, %27 : vector<4x128xf32>
    %c0_11 = arith.constant 0 : index
    %c0_12 = arith.constant 0 : index
    %29 = vector.load %arg4[%c0_11, %c0_12] : memref<1x128xf32, #tpu.memory_space<vmem>>, vector<1x128xf32>
    %30 = vector.broadcast %29 : vector<1x128xf32> to vector<4x128xf32>
    %31 = arith.addf %28, %30 : vector<4x128xf32>
    %c0_13 = arith.constant 0 : index
    %c0_14 = arith.constant 0 : index
    %32 = vector.load %arg5[%c0_13, %c0_14] : memref<4x128xf32, #tpu.memory_space<vmem>>, vector<4x128xf32>
    tpu.vector_store %arg5[%c0_13, %c0_14], %31 {strides = array<i32>} : memref<4x128xf32, #tpu.memory_space<vmem>>, vector<4x128xf32>,
    return
  }
  func.func @transform_0(%arg0: i32) -> (i32, i32) {
    %c0_i32 = arith.constant 0 : i32
    %c0_i32_0 = arith.constant 0 : i32
    return %arg0, %c0_i32 : i32, i32
  }
  func.func @transform_1(%arg0: i32) -> (i32, i32) {
    %c0_i32 = arith.constant 0 : i32
    %c0_i32_0 = arith.constant 0 : i32
    %c0_i32_1 = arith.constant 0 : i32
    return %c0_i32, %c0_i32_0 : i32, i32
  }
  func.func @transform_2(%arg0: i32) -> (i32, i32) {
    %c0_i32 = arith.constant 0 : i32
    %c0_i32_0 = arith.constant 0 : i32
    %c0_i32_1 = arith.constant 0 : i32
    return %c0_i32, %c0_i32_0 : i32, i32
  }
  func.func @transform_3(%arg0: i32) -> (i32, i32) {
    %c0_i32 = arith.constant 0 : i32
    %c0_i32_0 = arith.constant 0 : i32
    %c0_i32_1 = arith.constant 0 : i32
    return %c0_i32, %c0_i32_0 : i32, i32
  }
  func.func @transform_4(%arg0: i32) -> (i32, i32) {
    %c0_i32 = arith.constant 0 : i32
    %c0_i32_0 = arith.constant 0 : i32
    return %arg0, %c0_i32 : i32, i32
  }
}

</mosaic_0001>

<bundles_post_ra>
// kernel: layer_norm.1
= control target key start
LH: loop header
LB: loop body
LE: loop exit
PB: predicated region body
PF: predicated region fallthrough
CT: control target
= control target key end

     0   :  { %v417_v0 = vmov 0.0   ;;  %vm418_vm0 = vmmov 0   ;;  %s526_s1 = inlined_call_operand.vmem [shape: bf16[128,128], index: 1, kind: input, shape index: {}]   ;;  %s527_s0 = inlined_call_operand.vmem [shape: f32[4,128], index: 0, kind: input, shape index: {}]   ;;  %s528_s2 = inlined_call_operand.vmem [shape: f32[1,128], index: 2, kind: input, shape index: {}]   ;;  %s529_s3 = inlined_call_operand.vmem [shape: f32[1,128], index: 3, kind: input, shape index: {}]   ;;  %s530_s4 = inlined_call_operand.vmem [shape: f32[4,128], index: 4, kind: output, shape index: {}]  }
   0x1   :  { %325 = vmatprep.subr.bf16.mxu0 %v417_v0  ;;  %345 = vmatprep.subr.bf16.mxu1 %v417_v0  ;;  %v407_v1 = vld [vmem:[%s526_s1 + $0x38] sm:$0xff]   ;;  %v408_v2 = vld [vmem:[%s526_s1 + $0x30] sm:$0xff]   ;;  %v409_v3 = vld [vmem:[%s526_s1 + $0x28] sm:$0xff]  }
   0x2   :  { %341 = vmatprep.mubr.msk.bf16.mxu0 %vm418_vm0, %v417_v0  ;;  %361 = vmatprep.mubr.msk.bf16.mxu1 %vm418_vm0, %v417_v0  ;;  %v410_v4 = vld [vmem:[%s526_s1 + $0x20] sm:$0xff]   ;;  %v411_v5 = vld [vmem:[%s526_s1 + $0x18] sm:$0xff]   ;;  %v412_v8 = vld [vmem:[%s526_s1 + $0x10] sm:$0xff]  }
   0x3   :  { %326 = vmatpush3.bf16.msra.mxu0 %v407_v1  ;;  %346 = vmatpush3.bf16.msra.mxu1 %v407_v1  ;;  %v474_v6 = vld [vmem:[%s527_s0] sm:$0xf]  ;;  %v413_v10 = vld [vmem:[%s526_s1 + $0x8] sm:$0xff]  }
   0x4   :  { %327 = vmatprep.subr.bf16.mxu0 %v417_v0  ;;  %347 = vmatprep.subr.bf16.mxu1 %v417_v0  ;;  %v35_v7 = vpack.c.bf16 %v474_v6, %v474_v6  ;;  %v414_v12 = vld [vmem:[%s526_s1] sm:$0xff]  }
   0x5   :  { %v287_v42 = vld [vmem:[%s528_s2] ss:$0 sm:$0xff] }
   0x6   :  { %v36_v9 = vunpack.c.l.bf16 %v35_v7  ;;  %v288_v44 = vld [vmem:[%s529_s3] ss:$0 sm:$0xff] }
   0x7   :  { %328 = vmatpush3.bf16.msra.mxu0 %v408_v2  ;;  %348 = vmatpush3.bf16.msra.mxu1 %v408_v2 }
   0x8   :  { %329 = vmatprep.subr.bf16.mxu0 %v417_v0  ;;  %349 = vmatprep.subr.bf16.mxu1 %v417_v0  ;;  %v37_v11 = vsub.f32 %v474_v6, %v36_v9 }
   0xa   :  { %v38_v13 = vpack.c.bf16 %v37_v11, %v37_v11 }
   0xb   :  { %330 = vmatpush3.bf16.msra.mxu0 %v409_v3  ;;  %350 = vmatpush3.bf16.msra.mxu1 %v409_v3 }
   0xc   :  { %331 = vmatprep.subr.bf16.mxu0 %v417_v0  ;;  %351 = vmatprep.subr.bf16.mxu1 %v417_v0 }
   0xf   :  { %332 = vmatpush3.bf16.msra.mxu0 %v410_v4  ;;  %352 = vmatpush3.bf16.msra.mxu1 %v410_v4 }
  0x10   :  { %333 = vmatprep.subr.bf16.mxu0 %v417_v0  ;;  %353 = vmatprep.subr.bf16.mxu1 %v417_v0 }
  0x13   :  { %334 = vmatpush3.bf16.msra.mxu0 %v411_v5  ;;  %354 = vmatpush3.bf16.msra.mxu1 %v411_v5 }
  0x14   :  { %335 = vmatprep.subr.bf16.mxu0 %v417_v0  ;;  %355 = vmatprep.subr.bf16.mxu1 %v417_v0 }
  0x17   :  { %336 = vmatpush3.bf16.msra.mxu0 %v412_v8  ;;  %356 = vmatpush3.bf16.msra.mxu1 %v412_v8 }
  0x18   :  { %337 = vmatprep.subr.bf16.mxu0 %v417_v0  ;;  %357 = vmatprep.subr.bf16.mxu1 %v417_v0 }
  0x1b   :  { %338 = vmatpush3.bf16.msra.mxu0 %v413_v10  ;;  %358 = vmatpush3.bf16.msra.mxu1 %v413_v10 }
  0x1c   :  { %339 = vmatprep.subr.bf16.mxu0 %v417_v0  ;;  %359 = vmatprep.subr.bf16.mxu1 %v417_v0 }
  0x1f   :  { %340 = vmatpush3.bf16.msra.mxu0 %v414_v12  ;;  %360 = vmatpush3.bf16.msra.mxu1 %v414_v12 }
  0x20   :  { %385 = vmatprep.subr.bf16.mxu1 %v417_v0  ;;  %365 = vmatprep.subr.bf16.mxu0 %v417_v0 }
  0x22   :  { %342 = vmatmul.mubr.bf16.vlgmr.msra.gmra.mxu0 %v38_v13  ;;  %362 = vmatmul.mubr.bf16.vlgmr.msra.gmra.mxu1 %v35_v7 }
  0x23   :  { %386 = vmatpush3.bf16.msra.mxu1 %v407_v1  ;;  %366 = vmatpush3.bf16.msra.mxu0 %v407_v1 }
  0x24   :  { %387 = vmatprep.subr.bf16.mxu1 %v417_v0  ;;  %367 = vmatprep.subr.bf16.mxu0 %v417_v0 }
  0x25   :  { %401 = vmatprep.mubr.msk.bf16.mxu1 %vm418_vm0, %v417_v0  ;;  %381 = vmatprep.mubr.msk.bf16.mxu0 %vm418_vm0, %v417_v0 }
  0x27   :  { %388 = vmatpush3.bf16.msra.mxu1 %v408_v2  ;;  %368 = vmatpush3.bf16.msra.mxu0 %v408_v2 }
  0x28   :  { %389 = vmatprep.subr.bf16.mxu1 %v417_v0  ;;  %369 = vmatprep.subr.bf16.mxu0 %v417_v0 }
  0x2b   :  { %390 = vmatpush3.bf16.msra.mxu1 %v409_v3  ;;  %370 = vmatpush3.bf16.msra.mxu0 %v409_v3 }
  0x2c   :  { %391 = vmatprep.subr.bf16.mxu1 %v417_v0  ;;  %371 = vmatprep.subr.bf16.mxu0 %v417_v0 }
  0x2f   :  { %392 = vmatpush3.bf16.msra.mxu1 %v410_v4  ;;  %372 = vmatpush3.bf16.msra.mxu0 %v410_v4 }
  0x30   :  { %393 = vmatprep.subr.bf16.mxu1 %v417_v0  ;;  %373 = vmatprep.subr.bf16.mxu0 %v417_v0 }
  0x33   :  { %394 = vmatpush3.bf16.msra.mxu1 %v411_v5  ;;  %374 = vmatpush3.bf16.msra.mxu0 %v411_v5 }
  0x34   :  { %395 = vmatprep.subr.bf16.mxu1 %v417_v0  ;;  %375 = vmatprep.subr.bf16.mxu0 %v417_v0 }
  0x37   :  { %396 = vmatpush3.bf16.msra.mxu1 %v412_v8  ;;  %376 = vmatpush3.bf16.msra.mxu0 %v412_v8 }
  0x38   :  { %397 = vmatprep.subr.bf16.mxu1 %v417_v0  ;;  %377 = vmatprep.subr.bf16.mxu0 %v417_v0 }
  0x3b   :  { %398 = vmatpush3.bf16.msra.mxu1 %v413_v10  ;;  %378 = vmatpush3.bf16.msra.mxu0 %v413_v10 }
  0x3c   :  { %399 = vmatprep.subr.bf16.mxu1 %v417_v0  ;;  %379 = vmatprep.subr.bf16.mxu0 %v417_v0 }
  0x3f   :  { %400 = vmatpush3.bf16.msra.mxu1 %v414_v12  ;;  %380 = vmatpush3.bf16.msra.mxu0 %v414_v12 }
  0xe2   :  { %v121_v14 = vpop.f32.mrf.mxu0  ;;  %v161_v15 = vpop.f32.mrf.mxu1 }
  0xe3   :  { %v162_v16 = vadd.f32 %v161_v15, %v121_v14 }
  0xe4   :  { %v343_v17 = vpop.f32.mrf.mxu0  ;;  %v363_v18 = vpop.f32.mrf.mxu1 }
  0xe5   :  { %v167_v19 = vmul.f32 0.03125, %v162_v16 }
  0xe6   :  { %v124_v20 = vpop.f32.mrf.mxu0  ;;  %v164_v21 = vpop.f32.mrf.mxu1 }
  0xe7   :  { %v168_v22 = vsub.f32 %v474_v6, %v167_v19 }
  0xe8   :  { %v344_v23 = vpop.f32.mrf.mxu0  ;;  %v364_v24 = vpop.f32.mrf.mxu1 }
  0xe9   :  { %v169_v25 = vmul.f32 %v168_v22, %v168_v22 }
  0xeb   :  { %v170_v26 = vpack.c.bf16 %v169_v25, %v169_v25 }
  0xed   :  { %v171_v27 = vunpack.c.l.bf16 %v170_v26  ;;  %402 = vmatmul.mubr.bf16.vlgmr.msra.gmra.mxu1 %v170_v26 }
  0xef   :  { %v172_v28 = vsub.f32 %v169_v25, %v171_v27 }
  0xf1   :  { %v173_v29 = vpack.c.bf16 %v172_v28, %v172_v28 }
  0xf3   :  { %382 = vmatmul.mubr.bf16.vlgmr.msra.gmra.mxu0 %v173_v29 }
 0x1ad   :  { %v248_v30 = vpop.f32.mrf.mxu1 }
 0x1af   :  { %v403_v31 = vpop.f32.mrf.mxu1 }
 0x1b1   :  { %v251_v32 = vpop.f32.mrf.mxu1 }
 0x1b3   :  { %v208_v33 = vpop.f32.mrf.mxu0  ;;  %v404_v34 = vpop.f32.mrf.mxu1 }
 0x1b4   :  { %v249_v35 = vadd.f32 %v248_v30, %v208_v33 }
 0x1b5   :  { %v383_v36 = vpop.f32.mrf.mxu0 }
 0x1b6   :  { %v254_v37 = vmul.f32 0.03125, %v249_v35 }
 0x1b7   :  { %v211_v38 = vpop.f32.mrf.mxu0 }
 0x1b8   :  { %v255_v39 = vadd.f32 1e-05, %v254_v37 }
 0x1b9   :  { %v384_v40 = vpop.f32.mrf.mxu0 }
 0x1ba   :  { %415 = vrsqrt.f32 %v255_v39 }
 0x1c7   :  { %v416_v41 = vpop.eup %415 }
 0x1c8   :  { %v257_v43 = vmul.f32 %v416_v41, %v168_v22 }
 0x1ca   :  { %v265_v45 = vmul.f32 %v287_v42, %v257_v43 }
 0x1cc   :  { %v273_v46 = vadd.f32 %v288_v44, %v265_v45 }
 0x1ce   :  { %274 = vst [vmem:[%s530_s4] sm:$0xf] %v273_v46 }

</bundles_post_ra>
